<compile_context>
chip_gen: v6e
topology: v6e:2x2x1
jax: 0.10.0
libtpu: 0.0.40
codegen_flags: <defaults>
</compile_context>

<pallas_src>
import jax
import jax.numpy as jnp
from jax.experimental import pallas as pl
from jax.experimental.pallas import tpu as pltpu


def _round_up(a: int, b: int) -> int:
    return ((a + b - 1) // b) * b


def _sublane(dtype) -> int:
    """Native sublane multiple for this dtype (8 f32 / 16 bf16 / 32 int8-fp8)."""
    itemsize = jnp.dtype(dtype).itemsize
    if itemsize >= 4:
        return 8
    if itemsize == 2:
        return 16
    return 32


def _make_kernel(*, dim: int, num_streams: int, in_cols: int, has_emb: bool):
    """Build the kernel body for a given static configuration.

    in_cols: number of x columns the kernel receives per block (may differ from
             dim when the slice/pad branch is folded in-kernel).
    """

    def kernel(x_ref, *rest):
        if has_emb:
            emb_ref, o_ref = rest
        else:
            emb_ref = None
            (o_ref,) = rest

        x = x_ref[...]

        # --- dimension adjustment, done in VMEM (no extra HBM pass over x) ---
        if in_cols > dim:              # slice case (only when dim % 128 != 0)
            x = x[:, :dim]
        elif in_cols < dim:            # pad case: zero-fill missing columns
            zeros = jnp.zeros((x.shape[0], dim - in_cols), dtype=x.dtype)
            x = jnp.concatenate([x, zeros], axis=-1)

        if dim % 128 == 0:
            # Lane-aligned: per-stream unmasked slice stores; avoids building a
            # (tm, ns*dim) temporary and holding ns live copies of x in vregs.
            for n in range(num_streams):
                v = x
                if has_emb:
                    v = v + emb_ref[:, n * dim:(n + 1) * dim]
                o_ref[:, n * dim:(n + 1) * dim] = v.astype(o_ref.dtype)
        else:
            # Narrow dim: single lane-dense store of the replicated row.
            rep = jnp.concatenate([x] * num_streams, axis=-1)
            if has_emb:
                rep = rep + emb_ref[...]
            o_ref[...] = rep.astype(o_ref.dtype)

    return kernel


def expand_streams(x, stream_embeddings, *, dim, num_streams,
                   row_tile=4096, vmem_budget_bytes=24 << 20):
    """JAX/Pallas equivalent of ExpandStreams.forward.

    x: [batch, seq_len, input_dim]
    stream_embeddings: [num_streams, dim] or None (plain repeat, no embedding)
    returns: [batch, seq_len, num_streams * dim]
    """
    batch, seq_len, input_dim = x.shape
    rows = batch * seq_len
    out_cols = num_streams * dim
    dtype = x.dtype
    itemsize = jnp.dtype(dtype).itemsize
    sub = _sublane(dtype)

    x2d = x.reshape(rows, input_dim)

    # How many x columns each block reads.
    if input_dim == dim:
        in_cols = dim
    elif input_dim > dim and dim % 128 == 0:
        in_cols = dim          # BlockSpec selects only the first `dim` columns
    else:
        in_cols = input_dim    # read full row; slice / zero-pad in-kernel

    # --- row-tile selection ---
    if rows <= sub:
        tile = max(rows, 1)    # single block equal to the full row extent
    else:
        # VMEM cap: 2 buffers x (input + output) per tile must fit comfortably.
        bytes_per_row = 2 * (in_cols + out_cols) * itemsize
        cap = max(sub, vmem_budget_bytes // bytes_per_row)
        tile = min(row_tile, cap)
        # Ensure >= 2 grid steps so ("parallel",) can shard across TensorCores.
        tile = min(tile, _round_up(pl.cdiv(rows, 2), sub))
        tile = max(sub, (tile // sub) * sub)

    grid = (pl.cdiv(rows, tile),)

    has_emb = stream_embeddings is not None
    kernel = _make_kernel(dim=dim, num_streams=num_streams,
                          in_cols=in_cols, has_emb=has_emb)

    in_specs = [pl.BlockSpec((tile, in_cols), lambda i: (i, 0))]
    args = [x2d]
    if has_emb:
        emb_flat = stream_embeddings.reshape(1, out_cols).astype(dtype)
        in_specs.append(pl.BlockSpec((1, out_cols), lambda i: (0, 0)))
        args.append(emb_flat)

    bytes_accessed = (rows * in_cols + rows * out_cols
                      + (out_cols if has_emb else 0)) * itemsize
    cost = pl.CostEstimate(flops=rows * out_cols if has_emb else 0,
                           transcendentals=0,
                           bytes_accessed=bytes_accessed)

    # Scoped-VMEM limit: 2x the working set, clamped to [16 MiB, 48 MiB]
    # (48 MiB is safe even under v7x's 64 MiB physical VMEM per TensorCore).
    working = 2 * tile * (in_cols + out_cols) * itemsize + 2 * out_cols * itemsize
    vmem_limit = int(min(48 << 20, max(2 * working, 16 << 20)))

    out2d = pl.pallas_call(
        kernel,
        out_shape=jax.ShapeDtypeStruct((rows, out_cols), dtype),
        grid_spec=pl.GridSpec(
            grid=grid,
            in_specs=in_specs,
            # lane-dense output block: full last dim = num_streams*dim
            out_specs=pl.BlockSpec((tile, out_cols), lambda i: (i, 0)),
        ),
        compiler_params=pltpu.CompilerParams(
            dimension_semantics=("parallel",),
            vmem_limit_bytes=vmem_limit,
        ),
        cost_estimate=cost,
    )(*args)

    return out2d.reshape(batch, seq_len, out_cols)


def expand_streams_reference(x, stream_embeddings, *, dim, num_streams):
    """Pure-JAX reference mirroring the PyTorch forward."""
    batch, seq_len, input_dim = x.shape
    if input_dim != dim:
        if input_dim > dim:
            x = x[:, :, :dim]
        else:
            pad = jnp.zeros((batch, seq_len, dim - input_dim), dtype=x.dtype)
            x = jnp.concatenate([x, pad], axis=-1)
    x = jnp.tile(x, (1, 1, num_streams))                     # torch .repeat(1,1,ns)
    x = x.reshape(batch, seq_len, num_streams, dim)
    if stream_embeddings is not None:
        x = x + stream_embeddings[None, None, :, :]
    return x.reshape(batch, seq_len, num_streams * dim)


if __name__ == "__main__":
    # Small shapes consistent with the module's forward.
    batch, seq_len, dim, num_streams = 2, 8, 32, 4

    key = jax.random.PRNGKey(0)
    k_x, k_emb = jax.random.split(key)
    x = jax.random.normal(k_x, (batch, seq_len, dim), dtype=jnp.float32)
    # Deterministic parameter init (torch.randn(num_streams, dim) analogue).
    stream_embeddings = jax.random.normal(k_emb, (num_streams, dim), dtype=jnp.float32)

    # Main path: input_dim == dim, with embeddings.
    out = expand_streams(x, stream_embeddings, dim=dim, num_streams=num_streams)
    out = jax.block_until_ready(out)
    ref = expand_streams_reference(x, stream_embeddings, dim=dim, num_streams=num_streams)
    assert out.shape == (batch, seq_len, num_streams * dim), out.shape
    assert jnp.allclose(out, ref, atol=1e-6, rtol=1e-6), "mismatch vs reference (main)"

    # Slice path (input_dim > dim), no embeddings (plain repeat variant).
    x_wide = jax.random.normal(k_x, (batch, seq_len, dim + 8), dtype=jnp.float32)
    out_w = jax.block_until_ready(
        expand_streams(x_wide, None, dim=dim, num_streams=num_streams))
    ref_w = expand_streams_reference(x_wide, None, dim=dim, num_streams=num_streams)
    assert jnp.allclose(out_w, ref_w, atol=1e-6, rtol=1e-6), "mismatch vs reference (slice)"

    # Pad path (input_dim < dim), with embeddings.
    x_narrow = jax.random.normal(k_x, (batch, seq_len, dim - 8), dtype=jnp.float32)
    out_n = jax.block_until_ready(
        expand_streams(x_narrow, stream_embeddings, dim=dim, num_streams=num_streams))
    ref_n = expand_streams_reference(x_narrow, stream_embeddings, dim=dim, num_streams=num_streams)
    assert jnp.allclose(out_n, ref_n, atol=1e-6, rtol=1e-6), "mismatch vs reference (pad)"

    print("KERNEL_OK")
</pallas_src>

<mosaic_0001>
module attributes {stable_mosaic.version = 11 : i64} {
  func.func @kernel(%arg0: i32, %arg1: memref<8x32xf32, #tpu.memory_space<vmem>>, %arg2: memref<1x128xf32, #tpu.memory_space<vmem>>, %arg3: memref<8x128xf32, #tpu.memory_space<vmem>>) attributes {dimension_semantics = [#tpu.dimension_semantics<parallel>], iteration_bounds = array<i64: 2>, scalar_prefetch = 0 : i64, scratch_operands = 0 : i64, tpu.core_type = #tpu.core_type<tc>, window_params = [{transform_indices = @transform_0, window_bounds = array<i64: 8, 32>}, {pipeline_mode = #tpu.pipeline_mode<synchronous>, transform_indices = @transform_1, window_bounds = array<i64: 1, 128>}, {transform_indices = @transform_2, window_bounds = array<i64: 8, 128>}]} {
    %c0 = arith.constant 0 : index
    %c0_0 = arith.constant 0 : index
    %0 = vector.load %arg1[%c0, %c0_0] : memref<8x32xf32, #tpu.memory_space<vmem>>, vector<8x32xf32>
    %1 = tpu.concatenate %0, %0, %0, %0 in 1 : vector<8x32xf32>, vector<8x32xf32>, vector<8x32xf32>, vector<8x32xf32> -> vector<8x128xf32>
    %c0_1 = arith.constant 0 : index
    %c0_2 = arith.constant 0 : index
    %2 = vector.load %arg2[%c0_1, %c0_2] : memref<1x128xf32, #tpu.memory_space<vmem>>, vector<1x128xf32>
    %3 = vector.broadcast %2 : vector<1x128xf32> to vector<8x128xf32>
    %4 = arith.addf %1, %3 : vector<8x128xf32>
    %c0_3 = arith.constant 0 : index
    %c0_4 = arith.constant 0 : index
    %5 = vector.load %arg3[%c0_3, %c0_4] : memref<8x128xf32, #tpu.memory_space<vmem>>, vector<8x128xf32>
    tpu.vector_store %arg3[%c0_3, %c0_4], %4 {strides = array<i32>} : memref<8x128xf32, #tpu.memory_space<vmem>>, vector<8x128xf32>,
    return
  }
  func.func @transform_0(%arg0: i32) -> (i32, i32) {
    %c0_i32 = arith.constant 0 : i32
    %c0_i32_0 = arith.constant 0 : i32
    return %arg0, %c0_i32 : i32, i32
  }
  func.func @transform_1(%arg0: i32) -> (i32, i32) {
    %c0_i32 = arith.constant 0 : i32
    %c0_i32_0 = arith.constant 0 : i32
    %c0_i32_1 = arith.constant 0 : i32
    return %c0_i32, %c0_i32_0 : i32, i32
  }
  func.func @transform_2(%arg0: i32) -> (i32, i32) {
    %c0_i32 = arith.constant 0 : i32
    %c0_i32_0 = arith.constant 0 : i32
    return %arg0, %c0_i32 : i32, i32
  }
}

</mosaic_0001>

<bundles_post_ra>
// kernel: tpu_custom_call.1
= control target key start
LH: loop header
LB: loop body
LE: loop exit
PB: predicated region body
PF: predicated region fallthrough
CT: control target
= control target key end

     0   :  { %7 = vsyncpa [#allocation3], 0  ;;  %s589_s0 = inlined_call_operand.hbm [shape: f32[16,32], index: 0, kind: input, shape index: {}]   ;;  %s590_s1 = inlined_call_operand.vmem [shape: f32[1,128], index: 1, kind: input, shape index: {}]   ;;  %s591_s2 = inlined_call_operand.hbm [shape: f32[16,128], index: 2, kind: output, shape index: {}]  }
   0x1   :  { %9 = vsyncpa [#allocation3 + $0x1], 0 }
   0x2   :  { %10 = vsyncpa [#allocation4], 0 }
   0x3   :  { %12 = vsyncpa [#allocation4 + $0x1], 0  ;;  %s445_s9 = smov 0   ;;  %s447_s10 = smov 0  }
   0x4   :  { %s449_s11 = smov 0   ;;  %s451_s12 = smov 0  }
   0x5 LB: > { %s466_s13 = sadd.s32 4294967295, %s423_s12   ;;  %s269_s14 = sadd.s32 4294967294, %s423_s12   ;;  %s423_s12 = sphi %s451_s12, %s608_s12   ;;  %s419_s11 = sphi %s449_s11, %s607_s11   ;;  %s415_s10 = sphi %s447_s10, %s606_s10   ;;  %s411_s9 = sphi %s445_s9, %s605_s9  }
   0x6   : > { %s470_s15 = sadd.s32 1, %s423_s12   ;;  %s25_s16 = sadd.s32 1, %s419_s11 }
   0x7   : > { %s22_s17 = ssub.s32 %s423_s12, %s470_s15  ;;  %p32_p0 = scmp.ne.s32.totalorder %s419_s11, %s415_s10 }
   0x8   : > { %p23_p1 = scmp.eq.s32.totalorder %s22_s17, 0  ;;  %p33_p2 = scmp.eq.s32.totalorder %s423_s12, 0 }
   0x9   : > { %p38_p3 = scmp.ne.s32.totalorder %s415_s10, %s411_s9  ;;  %p39_p4 = scmp.eq.s32.totalorder %s466_s13, 0 }
   0xa   : > { %s482_s18 = scalar_select %p23_p1, %s419_s11, %s25_s16  }
   0xb   : > { %p484_p5 = por %p33_p2, %p32_p0  ;;  %p488_p6 = por %p39_p4, %p38_p3 }
   0xc   : > { %p83_p7 = scmp.eq.s32.totalorder %s466_s13, 1  ;;  %p89_p8 = scmp.eq.s32.totalorder %s269_s14, 1 }
   0xd   : > { %s595_s20 = scalar_select %p488_p6, 1, 0 }
   0xe   : > { %p294_p10 = scmp.lt.s32.totalorder %s423_s12, 2  ;;  %p495_p11 = por %p83_p7, %p32_p0 }
   0xf   : > { %p499_p12 = por %p89_p8, %p38_p3  ;;  %s112_s23 = sand.u32 1, %s419_s11  }
  0x10   : > { %s596_s21 = scalar_select %p495_p11, 1, 0 }
  0x11   : > { %s597_s22 = scalar_select %p499_p12, 1, 0 }
  0x12   : > { %s273_s24 = sshll.u32 %s423_s12, 7  ;;  %s272_s25 = sshll.u32 %s112_s23, 3 }
  0x13   : > { %s508_s28 = scalar_lea.hbm %s589_s0, %s273_s24  ;;  %s116_s29 = scalar_lea.vmem [#allocation2], %s272_s25 }
  0x14   : > { %s123_s30 = sshll.u32 %s116_s29, 4  ;;  %p512_p13 = pnand %p294_p10, %p484_p5  ;;  %s516_s30 = int_to_ptr.vmem [resolvable:$true] %s123_s30 }
  0x15   : > { %s113_s4 = scalar_lea.sflag [#allocation3], %s112_s23  ;;  %s331_s5 = scalar_lea.hbm %s508_s28, 128 }
  0x16   : > { %p332_p2 = scmp.ne.s32.totalorder %s508_s28, %s331_s5  ;;  %p333_p3 = pneg %p512_p13 }
  0x17   : > { %s336_s8 = scalar_lea.hbm %s589_s0, 256  ;;  %p337_p5 = scmp.lt.s32.totalorder %s508_s28, %s589_s0 }
  0x18   : > { %p334_p4 = pnand %p333_p3, %p332_p2  ;;  %p338_p8 = scmp.lt.s32.totalorder %s336_s8, %s331_s5 }
  0x1a   : > { %p335_p7 = pneg %p334_p4  ;;  %p339_p10 = por %p338_p8, %p337_p5 }
  0x1c   : > { %p340_p9 = pnand %p339_p10, %p335_p7 }
  0x1e   : > { %343 = shalt.err (!%p340_p9)
}
  0x1f   : > { %s344_s17 = scalar_lea.vmem %s516_s30, 128  ;;  %s425_s19 = smov [#allocation2]  }
  0x20   : > { %p345_p0 = scmp.ne.s32.totalorder %s516_s30, %s344_s17  ;;  %s349_s23 = sshll.u32 %s425_s19, 4  ;;  %s350_s23 = int_to_ptr.vmem [resolvable:$false] %s349_s23 }
  0x21   : > { %s351_s24 = scalar_lea.vmem %s350_s23, 256  ;;  %p352_p4 = scmp.lt.s32.totalorder %s516_s30, %s350_s23 }
  0x22   : > { %p347_p1 = pnand %p345_p0, %p333_p3  ;;  %p353_p12 = scmp.lt.s32.totalorder %s351_s24, %s344_s17 }
  0x24   : > { %p348_p2 = pneg %p347_p1  ;;  %p354_p11 = por %p353_p12, %p352_p4 }
  0x26   : > { %p355_p6 = pnand %p354_p11, %p348_p2 }
  0x28   : > { %358 = shalt.err (!%p355_p6)
}
  0x29   : > { %289 = dma.hbm_to_vmem [thread:$0]  (!%p512_p13), %s508_s28, 128, %s516_s30, %s113_s4  }
  0x2a   : > { %p599_p9 = scmp.lt.s32.totalorder %s423_s12, 3  ;;  %p600_p7 = scmp.ge.s32.totalorder %s423_s12, 1 }
  0x2c   : > { %p129_p0 = pnand %p600_p7, %p599_p9 }
  0x2d   : > { %s543_s25 = sand.u32 (!%p129_p0), 1, %s415_s10   ;;  %p601_p6 = scmp.ne.s32.totalorder (!%p129_p0), %s595_s20, 0 }
  0x2e   : > { %132 = sbr.rel (%p129_p0) target bundleno = 189 (0xbd), region = 28  ;;  %s275_s26 = sshll.u32 (!%p129_p0), %s543_s25, 3 }
  0x2f   : > { %s135_s27 = scalar_lea.sflag (!%p129_p0), [#allocation3], %s543_s25  ;;  %s138_s29 = scalar_lea.vmem (!%p129_p0), [#allocation2], %s275_s26 }
  0x33   : > { %402 = dma.done.wait (%p601_p6), %s135_s27, 128  }
  0x34   : > { %404 = vsyncadd (%p601_p6), %s135_s27, 4294967168  ;;  %v159_v0 = vld [vmem:[%s138_s29] sm:$0xff]  ;;  %s426_s28 = smov 32   ;;  %s427_s30 = smov 96   ;;  %vm170_vm0 = vcmask 261120   ;;  %vm172_vm1 = vcmask 523264  }
  0x35   : > { %161 = vrot.lane.b32.xlu0 %v159_v0, %s426_s28  ;;  %167 = vrot.lane.b32.xlu1 %v159_v0, %s427_s30  ;;  %s428_s3 = smov 64   ;;  %vm174_vm2 = vcmask 785408   ;;  %v277_v5 = vld [vmem:[%s590_s1] ss:$0 sm:$0xff]  ;;  %s279_s5 = sshll.u32 %s466_s13, 7 }
  0x36   : > { %s158_s6 = scalar_lea.vmem [#allocation5], %s275_s26  ;;  %s197_s16 = scalar_lea.hbm %s591_s2, %s279_s5 }
  0x37   : > { %s199_s7 = sshll.u32 %s158_s6, 4  ;;  %s186_s17 = scalar_lea.sflag [#allocation4], %s543_s25  ;;  %s200_s7 = int_to_ptr.vmem [resolvable:$true] %s199_s7 }
  0x38   : > { %s359_s19 = scalar_lea.vmem %s200_s7, 128  ;;  %p602_p12 = scmp.ne.s32.totalorder %s596_s21, 0 }
  0x39   : > { %164 = vrot.lane.b32.xlu0 %v159_v0, %s428_s3  ;;  %p360_p11 = scmp.ne.s32.totalorder %s200_s7, %s359_s19  ;;  %s429_s23 = smov [#allocation5]  }
  0x3a   : > { %s363_s24 = sshll.u32 %s429_s23, 4  ;;  %s364_s24 = int_to_ptr.vmem [resolvable:$false] %s363_s24 }
  0x3b   : > { %p361_p13 = pnand %p360_p11, %p602_p12  ;;  %s365_s13 = scalar_lea.vmem %s364_s24, 256 }
  0x3c   : > { %p366_p3 = scmp.lt.s32.totalorder %s200_s7, %s364_s24  ;;  %p367_p5 = scmp.lt.s32.totalorder %s365_s13, %s359_s19 }
  0x3d   : > { %p362_p1 = pneg %p361_p13 }
  0x3e   : > { %p368_p8 = por %p367_p5, %p366_p3 }
  0x40   : > { %p369_p10 = pnand %p368_p8, %p362_p1 }
  0xa7   : > { %v162_v1 = vpop.permute.xlu0 %161  ;;  %v168_v2 = vpop.permute.xlu1 %167 }
  0xa8   : > { %v171_v3 = vsel %vm170_vm0, %v159_v0, %v162_v1 }
  0xab   : > { %v165_v4 = vpop.permute.xlu0 %164 }
  0xac   : > { %v173_v6 = vsel %vm172_vm1, %v171_v3, %v165_v4 }
  0xad   : > { %v175_v7 = vsel %vm174_vm2, %v173_v6, %v168_v2 }
  0xae   : > { %v183_v8 = vadd.f32 %v277_v5, %v175_v7 }
  0xb0   : > { %184 = vst [vmem:[%s158_s6] sm:$0xff] %v183_v8 }
  0xb1   : > { %372 = shalt.err (!%p369_p10)
}
  0xb2   : > { %s373_s26 = scalar_lea.hbm %s197_s16, 128  ;;  %s377_s29 = scalar_lea.hbm %s591_s2, 256 }
  0xb3   : > { %p374_p2 = scmp.ne.s32.totalorder %s197_s16, %s373_s26  ;;  %p378_p7 = scmp.lt.s32.totalorder %s197_s16, %s591_s2 }
  0xb4   : > { %p379_p0 = scmp.lt.s32.totalorder %s377_s29, %s373_s26 }
  0xb5   : > { %p375_p4 = pnand %p374_p2, %p602_p12 }
  0xb6   : > { %p380_p6 = por %p379_p0, %p378_p7 }
  0xb7   : > { %p376_p9 = pneg %p375_p4 }
  0xb9   : > { %p381_p11 = pnand %p380_p6, %p376_p9 }
  0xbb   : > { %384 = shalt.err (!%p381_p11)
}
  0xbc   : > { %284 = dma.vmem_to_hbm [thread:$0]  (%p602_p12), %s200_s7, 128, %s197_s16, %s186_s17  }
  0xbd PF: > { %s211_s3 = sand.u32 1, %s411_s9   ;;  %p603_p13 = scmp.ne.s32.totalorder %s597_s22, 0 }
  0xbe   : > { %p604_p1 = scmp.ge.s32.totalorder %s423_s12, 2  ;;  %s212_s4 = scalar_lea.sflag [#allocation4], %s211_s3 }
  0xc0   : > { %p291_p3 = pnand %p604_p1, %p603_p13 }
  0xc2   : > { %p292_p5 = pneg %p291_p3 }
  0xc4   : > { %406 = dma.done.wait (%p292_p5), %s212_s4, 128  }
  0xc5   : > { %408 = vsyncadd (%p292_p5), %s212_s4, 4294967168  ;;  %p15_p8 = scmp.ge.s32.totalorder %s470_s15, 4   ;;  %s605_s9 = smov %s415_s10 }
  0xc6   : > { %s606_s10 = smov %s419_s11  ;;  %s607_s11 = smov %s482_s18 }
  0xc7   : > { %s608_s12 = smov %s470_s15  ;;  %17 = sbr.rel (!%p15_p8) target bundleno = 5 (0x5), region = 73 }
  0xcc   :  { %217 = vsyncpa [#allocation3], 1 }
  0xcd   :  { %219 = vsyncpa [#allocation3 + $0x1], 1 }
  0xce   :  { %220 = vsyncpa [#allocation4], 1 }
  0xcf   :  { %222 = vsyncpa [#allocation4 + $0x1], 1 }

</bundles_post_ra>
